<compile_context>
chip_gen: v6e
topology: v6e:2x2x1
jax: 0.10.0
libtpu: 0.0.40
codegen_flags: <defaults>
</compile_context>

<pallas_src>
import functools

import jax
import jax.numpy as jnp
from jax.experimental import pallas as pl
from jax.experimental.pallas import tpu as pltpu


_TARGET_BLOCK_BYTES = 8 * 1024 * 1024   # ~8 MiB per input block
_VMEM_LIMIT_BYTES = 40 * 1024 * 1024    # 4x block (double-buffered in+out) + headroom;
                                        # fits v5e/v6e (128 MiB) and v7x (64 MiB physical)


def _double_swish_kernel(x_ref, o_ref, *, compute_dtype):
    # Elementwise hot path: y = x * sigmoid(x - 1)  (VPU + EUP).
    x = x_ref[...].astype(compute_dtype)
    one = jnp.asarray(1.0, compute_dtype)
    s = jax.nn.sigmoid(x - one)
    o_ref[...] = (x * s).astype(o_ref.dtype)


def _sublane_multiple(itemsize: int) -> int:
    # f32 -> 8, bf16/f16 -> 16, int8/fp8 -> 32 (sub-32-bit dtypes pack sublanes).
    return 8 * max(1, 4 // max(1, itemsize))


def _round_up(a: int, b: int) -> int:
    return -(-a // b) * b


def _pick_width(n: int) -> int:
    # Wide lane-dense slab width (multiple of 128); prefer one dividing n so
    # no padding is needed.  Fallback 128 => pad only to next multiple of 128.
    for w in (4096, 2048, 1024, 512, 256, 128):
        if n % w == 0:
            return w
    return 128


def double_swish(x: jax.Array, *, compute_in_float32: bool | None = None) -> jax.Array:
    """Apply double_swish(x) = x * sigmoid(x - 1) elementwise via a Pallas kernel."""
    orig_shape = x.shape
    dtype = x.dtype
    itemsize = jnp.dtype(dtype).itemsize
    n = x.size

    if compute_in_float32 is None:
        # bf16: compute bf16-native (result is bf16 anyway); f16/f32: compute
        # in f32, matching the reference's fp16->fp32 promotion.
        compute_in_float32 = dtype != jnp.bfloat16
    compute_dtype = jnp.float32 if compute_in_float32 else dtype

    w = _pick_width(n)
    n_pad = _round_up(n, w)
    padded = n_pad != n

    x_flat = x.reshape(-1)
    if padded:
        # double_swish(0) == 0, so zero padding is benign.
        # TODO(synk): pad + output slice add extra HBM passes for n % 128 != 0;
        # call under the caller's jit (or fuse into the producer) to hide them.
        x_flat = jnp.pad(x_flat, (0, n_pad - n))

    rows = n_pad // w
    x2d = x_flat.reshape(rows, w)

    sub = _sublane_multiple(itemsize)
    # Biggest row tile that keeps the block near _TARGET_BLOCK_BYTES.
    max_tile = max(sub, (_TARGET_BLOCK_BYTES // (w * itemsize)) // sub * sub)
    if rows <= 8:
        row_tile = rows  # single full-extent block (always a legal block shape)
    else:
        # Guarantee >= 2 grid steps where legal: the "parallel" axis then
        # shards across v7x's two TensorCores (neutral on v5e/v6e).
        half = _round_up(pl.cdiv(rows, 2), 8)
        row_tile = max(8, min(max_tile, half, rows))
    grid = (pl.cdiv(rows, row_tile),)

    cost = pl.CostEstimate(
        flops=4 * n_pad,
        transcendentals=n_pad,
        bytes_accessed=2 * n_pad * itemsize,
    )

    kernel = functools.partial(_double_swish_kernel, compute_dtype=compute_dtype)

    y2d = pl.pallas_call(
        kernel,
        out_shape=jax.ShapeDtypeStruct((rows, w), dtype),
        grid_spec=pltpu.PrefetchScalarGridSpec(
            num_scalar_prefetch=0,
            grid=grid,
            in_specs=[pl.BlockSpec((row_tile, w), lambda i: (i, 0))],
            out_specs=pl.BlockSpec((row_tile, w), lambda i: (i, 0)),
        ),
        compiler_params=pltpu.CompilerParams(
            dimension_semantics=("parallel",),
            vmem_limit_bytes=_VMEM_LIMIT_BYTES,
        ),
        cost_estimate=cost,
    )(x2d)

    y_flat = y2d.reshape(-1)
    if padded:
        y_flat = y_flat[:n]
    return y_flat.reshape(orig_shape)


def _ref(x):
    xf = x.astype(jnp.float32)
    return (xf * jax.nn.sigmoid(xf - 1.0)).astype(x.dtype)


if __name__ == "__main__":
    key = jax.random.PRNGKey(0)
    k1, k2, k3 = jax.random.split(key, 3)

    # 1) Small NCHW-like activation input (no-pad, single-block path).
    x = jax.random.normal(key, (2, 4, 16, 16), dtype=jnp.float32)
    y = double_swish(x)
    jax.block_until_ready(y)
    assert y.shape == x.shape and y.dtype == x.dtype
    assert jnp.allclose(y, _ref(x), atol=1e-6, rtol=1e-6)

    # 2) Awkward size exercising the padded / ragged multi-block path.
    x2 = jax.random.normal(k1, (3, 5, 7, 11), dtype=jnp.float32)
    y2 = double_swish(x2)
    jax.block_until_ready(y2)
    assert jnp.allclose(y2, _ref(x2), atol=1e-6, rtol=1e-6)

    # 3) bf16 input: bf16-native compute, >=2 blocks, ragged last block.
    x3 = jax.random.normal(k2, (2, 50, 384), dtype=jnp.bfloat16)
    y3 = double_swish(x3)
    jax.block_until_ready(y3)
    assert jnp.allclose(
        y3.astype(jnp.float32), _ref(x3).astype(jnp.float32), atol=3e-2, rtol=3e-2
    )

    # 4) f32 multi-block path (grid >= 2, no padding).
    x4 = jax.random.normal(k3, (2, 192, 512), dtype=jnp.float32)
    y4 = double_swish(x4)
    jax.block_until_ready(y4)
    assert jnp.allclose(y4, _ref(x4), atol=1e-6, rtol=1e-6)

    print("KERNEL_OK")
</pallas_src>

<mosaic_0001>
module attributes {stable_mosaic.version = 11 : i64} {
  func.func @_double_swish_kernel(%arg0: i32, %arg1: memref<1x2048xf32, #tpu.memory_space<vmem>>, %arg2: memref<1x2048xf32, #tpu.memory_space<vmem>>) attributes {dimension_semantics = [#tpu.dimension_semantics<parallel>], iteration_bounds = array<i64: 1>, scalar_prefetch = 0 : i64, scratch_operands = 0 : i64, tpu.core_type = #tpu.core_type<tc>, window_params = [{transform_indices = @transform_0, window_bounds = array<i64: 1, 2048>}, {transform_indices = @transform_1, window_bounds = array<i64: 1, 2048>}]} {
    %c0 = arith.constant 0 : index
    %c0_0 = arith.constant 0 : index
    %0 = vector.load %arg1[%c0, %c0_0] : memref<1x2048xf32, #tpu.memory_space<vmem>>, vector<1x2048xf32>
    %cst = arith.constant 1.000000e+00 : f32
    %1 = vector.broadcast %cst : f32 to vector<1x2048xf32>
    %2 = arith.subf %0, %1 : vector<1x2048xf32>
    %3 = arith.negf %2 : vector<1x2048xf32>
    %4 = math.exp %3 : vector<1x2048xf32>
    %cst_1 = arith.constant 1.000000e+00 : f32
    %5 = vector.broadcast %cst_1 : f32 to vector<1x2048xf32>
    %6 = arith.addf %5, %4 : vector<1x2048xf32>
    %7 = arith.divf %5, %6 : vector<1x2048xf32>
    %8 = arith.mulf %0, %7 : vector<1x2048xf32>
    %c0_2 = arith.constant 0 : index
    %c0_3 = arith.constant 0 : index
    %9 = vector.load %arg2[%c0_2, %c0_3] : memref<1x2048xf32, #tpu.memory_space<vmem>>, vector<1x2048xf32>
    tpu.vector_store %arg2[%c0_2, %c0_3], %8 {strides = array<i32>} : memref<1x2048xf32, #tpu.memory_space<vmem>>, vector<1x2048xf32>,
    return
  }
  func.func @transform_0(%arg0: i32) -> (i32, i32) {
    %c0_i32 = arith.constant 0 : i32
    %c0_i32_0 = arith.constant 0 : i32
    return %arg0, %c0_i32 : i32, i32
  }
  func.func @transform_1(%arg0: i32) -> (i32, i32) {
    %c0_i32 = arith.constant 0 : i32
    %c0_i32_0 = arith.constant 0 : i32
    return %arg0, %c0_i32 : i32, i32
  }
}

</mosaic_0001>

<bundles_post_ra>
// kernel: tpu_custom_call.1
= control target key start
LH: loop header
LB: loop body
LE: loop exit
PB: predicated region body
PF: predicated region fallthrough
CT: control target
= control target key end

     0   :  { %6 = vsyncpa [#allocation3], 0  ;;  %s132_s0 = inlined_call_operand.hbm [shape: f32[1,2048], index: 0, kind: input, shape index: {}]   ;;  %s133_s1 = inlined_call_operand.hbm [shape: f32[1,2048], index: 1, kind: output, shape index: {}]  }
   0x1   :  { %7 = vsyncpa [#allocation4], 0  ;;  %s114_s6 = smov [#allocation2]  }
   0x2   :  { %s14_s7 = sshll.u32 %s114_s6, 4  ;;  %s15_s7 = int_to_ptr.vmem [resolvable:$true] %s14_s7 }
   0x3   :  { %s78_s8 = scalar_lea.vmem %s15_s7, 256  ;;  %p83_p1 = scmp.lt.s32.totalorder %s15_s7, %s15_s7 }
   0x4   :  { %p79_p0 = scmp.ne.s32.totalorder %s15_s7, %s78_s8  ;;  %p84_p2 = scmp.lt.s32.totalorder %s78_s8, %s78_s8 }
   0x6   :  { %p85_p3 = por %p84_p2, %p83_p1 }
   0x8   :  { %p86_p4 = pnand %p85_p3, %p79_p0 }
   0xa   :  { %89 = shalt.err (!%p86_p4)
}
   0xb   :  { %17 = dma.hbm_to_vmem [thread:$0]  %s132_s0, 256, %s15_s7, [#allocation3]  }
   0xc   :  { %110 = dma.done.wait [#allocation3], 256  }
   0xd   :  { %111 = vsyncadd [#allocation3], 4294967040  ;;  %v21_v0 = vld [vmem:[#allocation2] sm:$0xff]  ;;  %v22_v1 = vld [vmem:[#allocation2 + $0x8] sm:$0xff]  ;;  %s115_s11 = smov [#allocation5]  }
   0xe   :  { %v56_v2 = vadd.f32 -1.0, %v21_v0  ;;  %v57_v3 = vadd.f32 -1.0, %v22_v1  ;;  %s47_s12 = sshll.u32 %s115_s11, 4  ;;  %s48_s12 = int_to_ptr.vmem [resolvable:$true] %s47_s12 }
   0xf   :  { %s90_s0 = scalar_lea.vmem %s48_s12, 256  ;;  %p95_p6 = scmp.lt.s32.totalorder %s48_s12, %s48_s12 }
  0x10   :  { %v58_v4 = vmul.f32 -1.442695, %v56_v2  ;;  %v59_v5 = vmul.f32 -1.442695, %v57_v3  ;;  %p91_p5 = scmp.ne.s32.totalorder %s48_s12, %s90_s0  ;;  %p96_p7 = scmp.lt.s32.totalorder %s90_s0, %s90_s0 }
  0x12   :  { %62 = vpow2.f32 %v58_v4  ;;  %p97_p8 = por %p96_p7, %p95_p6 }
  0x13   :  { %64 = vpow2.f32 %v59_v5 }
  0x14   :  { %p98_p9 = pnand %p97_p8, %p91_p5 }
  0x1f   :  { %v63_v6 = vpop.eup %62 }
  0x20   :  { %v65_v7 = vpop.eup %64  ;;  %v31_v8 = vadd.f32 1.0, %v63_v6 }
  0x21   :  { %v32_v9 = vadd.f32 1.0, %v65_v7 }
  0x22   :  { %66 = vrcp.f32 %v31_v8 }
  0x23   :  { %68 = vrcp.f32 %v32_v9 }
  0x2f   :  { %v67_v10 = vpop.eup %66 }
  0x30   :  { %v69_v11 = vpop.eup %68  ;;  %v37_v12 = vmul.f32 %v67_v10, %v21_v0 }
  0x31   :  { %v38_v13 = vmul.f32 %v69_v11, %v22_v1 }
  0x32   :  { %39 = vst [vmem:[#allocation5] sm:$0xff] %v37_v12 }
  0x33   :  { %40 = vst [vmem:[#allocation5 + $0x8] sm:$0xff] %v38_v13 }
  0x34   :  { %101 = shalt.err (!%p98_p9)
}
  0x35   :  { %50 = dma.vmem_to_hbm [thread:$0]  %s48_s12, 256, %s133_s1, [#allocation4]  }
  0x36   :  { %112 = dma.done.wait [#allocation4], 256  }
  0x37   :  { %113 = vsyncadd [#allocation4], 4294967040 }
  0x38   :  { %54 = vsyncpa [#allocation3], 1 }
  0x39   :  { %55 = vsyncpa [#allocation4], 1 }

</bundles_post_ra>
